<compile_context>
chip_gen: v6e
topology: v6e:2x2x1
jax: 0.10.0
libtpu: 0.0.40
codegen_flags: <defaults>
</compile_context>

<pallas_src>
import functools

import jax
import jax.numpy as jnp
from jax.experimental import pallas as pl
from jax.experimental.pallas import tpu as pltpu


def mlp_kernel(x_ref, w1_ref, b1_ref, w2_ref, b2_ref, o_ref):
    # Cast the activation tile to bf16 in-kernel (hidden under the DMA).
    x_bf = x_ref[...].astype(jnp.bfloat16)
    # fc1: bf16 operands on the MXU, f32 accumulation.
    h = jnp.dot(x_bf, w1_ref[...], preferred_element_type=jnp.float32)
    # Bias + ReLU in f32 (v5e VPU has no bf16 path; keep the epilogue f32).
    h = jnp.maximum(h + b1_ref[...], 0.0)
    # fc2: cast activation to bf16 for the MXU, accumulate in f32.
    y = jnp.dot(h.astype(jnp.bfloat16), w2_ref[...],
                preferred_element_type=jnp.float32)
    y = y + b2_ref[...]
    o_ref[...] = jax.nn.sigmoid(y).astype(o_ref.dtype)


def _round_up(n, m):
    return ((n + m - 1) // m) * m


@functools.lru_cache(maxsize=1)
def _vmem_budget_and_limit():
    """Generation-aware (budget, vmem_limit) in bytes."""
    try:
        cap = int(getattr(pltpu.get_tpu_info(), "vmem_capacity_bytes", 64 << 20))
    except Exception:
        cap = 64 << 20
    if cap >= (100 << 20):            # v5e / v6e: 128 MiB physical VMEM
        return 72 << 20, 96 << 20
    return 24 << 20, 32 << 20         # v7x: 64 MiB physical, 32 MiB scoped default


def _pick_batch_tile(batch, n_in, hidden, n_out, budget_bytes, max_tb=2048):
    """Largest batch tile (multiple of 8, <= max_tb) whose real VMEM footprint
    (double-buffered x/out tiles AND double-buffered resident weights, plus the
    in-kernel bf16/f32 intermediates) stays under the budget.  Also capped so
    the batch grid keeps ~4+ steps when B is large (v7x megacore / pipelining)
    without dropping below 512 rows (~85% of HBM roofline)."""
    lane = lambda n: _round_up(n, 128)
    # Pallas double-buffers every in_spec, including constant-index weights.
    weight_bytes = 2 * (2 * (lane(hidden) * _round_up(n_in, 8)       # W1 bf16
                             + lane(n_out) * _round_up(hidden, 8))   # W2 bf16
                        + 4 * (lane(hidden) + lane(n_out)))          # b1/b2 f32
    # Per batch-row: f32 x tile (x2 buffers) + f32 out tile (x2 buffers)
    # + in-kernel intermediates (bf16 x, f32 h, bf16 h, f32 y).
    per_row = (2 * 4 * lane(n_in) + 2 * 4 * lane(n_out)
               + 2 * lane(n_in) + 6 * lane(hidden) + 4 * lane(n_out))
    tb = max_tb
    while tb > 8 and weight_bytes + tb * per_row > budget_bytes:
        tb //= 2
    tb = min(tb,
             max(512, _round_up(pl.cdiv(batch, 4), 8)),  # keep >= ~4 grid steps
             _round_up(batch, 8))                        # never exceed the batch
    return max(8, (tb // 8) * 8)


@functools.partial(jax.jit, static_argnames=("max_block_b",))
def multilabel_nn_forward(x, w1, b1, w2, b2, *, max_block_b=2048):
    """x: [B, n_inputs] f32, w1: [n_inputs, 64], b1: [1, 64],
    w2: [64, n_outputs], b2: [1, n_outputs] -> [B, n_outputs] f32."""
    B, n_in = x.shape
    hidden = w1.shape[1]
    n_out = w2.shape[1]

    budget, vmem_limit = _vmem_budget_and_limit()
    TB = _pick_batch_tile(B, n_in, hidden, n_out, budget, max_tb=max_block_b)
    grid = (pl.cdiv(B, TB),)

    # Weights to bf16 once (tiny, one-time); biases stay f32; x stays f32 in
    # HBM and is cast to bf16 inside the kernel.
    w1_bf = w1.astype(jnp.bfloat16)
    w2_bf = w2.astype(jnp.bfloat16)

    cost = pl.CostEstimate(
        flops=2 * B * (n_in * hidden + hidden * n_out),
        transcendentals=B * n_out,                      # sigmoid exp
        bytes_accessed=(4 * B * n_in                    # x (f32)
                        + 2 * (n_in * hidden + hidden * n_out)  # weights (bf16)
                        + 4 * (hidden + n_out)          # biases (f32)
                        + 4 * B * n_out),               # output (f32)
    )

    out = pl.pallas_call(
        mlp_kernel,
        out_shape=jax.ShapeDtypeStruct((B, n_out), jnp.float32),
        grid_spec=pltpu.PrefetchScalarGridSpec(
            num_scalar_prefetch=0,
            grid=grid,
            in_specs=[
                pl.BlockSpec((TB, n_in), lambda i: (i, 0)),      # x tile (f32)
                pl.BlockSpec((n_in, hidden), lambda i: (0, 0)),  # W1 resident
                pl.BlockSpec((1, hidden), lambda i: (0, 0)),     # b1 resident
                pl.BlockSpec((hidden, n_out), lambda i: (0, 0)), # W2 resident
                pl.BlockSpec((1, n_out), lambda i: (0, 0)),      # b2 resident
            ],
            out_specs=pl.BlockSpec((TB, n_out), lambda i: (i, 0)),
        ),
        compiler_params=pltpu.CompilerParams(
            dimension_semantics=("parallel",),   # shards batch across v7x TCs
            vmem_limit_bytes=vmem_limit,
        ),
        cost_estimate=cost,
    )(x, w1_bf, b1, w2_bf, b2)

    return out


def init_params(key, n_inputs, n_outputs, hidden=64):
    """PyTorch-style uniform(-1/sqrt(fan_in), 1/sqrt(fan_in)) init."""
    k1, k2, k3, k4 = jax.random.split(key, 4)
    bound1 = 1.0 / (n_inputs ** 0.5)
    bound2 = 1.0 / (hidden ** 0.5)
    w1 = jax.random.uniform(k1, (n_inputs, hidden), jnp.float32, -bound1, bound1)
    b1 = jax.random.uniform(k2, (1, hidden), jnp.float32, -bound1, bound1)
    w2 = jax.random.uniform(k3, (hidden, n_outputs), jnp.float32, -bound2, bound2)
    b2 = jax.random.uniform(k4, (1, n_outputs), jnp.float32, -bound2, bound2)
    return w1, b1, w2, b2


if __name__ == "__main__":
    key = jax.random.PRNGKey(0)
    n_inputs, n_outputs, batch = 32, 16, 8

    kx, kp = jax.random.split(key)
    x = jax.random.normal(kx, (batch, n_inputs), dtype=jnp.float32)
    w1, b1, w2, b2 = init_params(kp, n_inputs, n_outputs)

    out = multilabel_nn_forward(x, w1, b1, w2, b2)
    out = jax.block_until_ready(out)
    assert out.shape == (batch, n_outputs)

    # Reference 1: same math as the PyTorch module, full f32 (loose tol: the
    # kernel uses bf16 matmul operands with f32 accumulation).
    ref_f32 = jax.nn.sigmoid(jnp.maximum(x @ w1 + b1, 0.0) @ w2 + b2)
    assert jnp.allclose(out, ref_f32, atol=2e-2, rtol=2e-2)

    # Reference 2: bf16-operand / f32-accumulate math (tight tol).
    h_ref = jnp.maximum(
        jnp.dot(x.astype(jnp.bfloat16), w1.astype(jnp.bfloat16),
                preferred_element_type=jnp.float32) + b1, 0.0)
    ref_bf16 = jax.nn.sigmoid(
        jnp.dot(h_ref.astype(jnp.bfloat16), w2.astype(jnp.bfloat16),
                preferred_element_type=jnp.float32) + b2)
    assert jnp.allclose(out, ref_bf16, atol=2e-3, rtol=2e-3)

    print("KERNEL_OK")
</pallas_src>

<mosaic_0001>
module attributes {stable_mosaic.version = 11 : i64} {
  func.func @mlp_kernel(%arg0: i32, %arg1: memref<8x32xf32, #tpu.memory_space<vmem>>, %arg2: memref<32x64xbf16, #tpu.memory_space<vmem>>, %arg3: memref<1x64xf32, #tpu.memory_space<vmem>>, %arg4: memref<64x16xbf16, #tpu.memory_space<vmem>>, %arg5: memref<1x16xf32, #tpu.memory_space<vmem>>, %arg6: memref<8x16xf32, #tpu.memory_space<vmem>>) attributes {dimension_semantics = [#tpu.dimension_semantics<parallel>], iteration_bounds = array<i64: 1>, scalar_prefetch = 0 : i64, scratch_operands = 0 : i64, tpu.core_type = #tpu.core_type<tc>, window_params = [{transform_indices = @transform_0, window_bounds = array<i64: 8, 32>}, {pipeline_mode = #tpu.pipeline_mode<synchronous>, transform_indices = @transform_1, window_bounds = array<i64: 32, 64>}, {pipeline_mode = #tpu.pipeline_mode<synchronous>, transform_indices = @transform_2, window_bounds = array<i64: 1, 64>}, {pipeline_mode = #tpu.pipeline_mode<synchronous>, transform_indices = @transform_3, window_bounds = array<i64: 64, 16>}, {pipeline_mode = #tpu.pipeline_mode<synchronous>, transform_indices = @transform_4, window_bounds = array<i64: 1, 16>}, {transform_indices = @transform_5, window_bounds = array<i64: 8, 16>}]} {
    %c0 = arith.constant 0 : index
    %c0_0 = arith.constant 0 : index
    %0 = vector.load %arg1[%c0, %c0_0] : memref<8x32xf32, #tpu.memory_space<vmem>>, vector<8x32xf32>
    %1 = arith.truncf %0 : vector<8x32xf32> to vector<8x32xbf16>
    %c0_1 = arith.constant 0 : index
    %c0_2 = arith.constant 0 : index
    %2 = vector.load %arg2[%c0_1, %c0_2] : memref<32x64xbf16, #tpu.memory_space<vmem>>, vector<32x64xbf16>
    %cst = arith.constant dense<0.000000e+00> : vector<8x64xf32>
    %3 = tpu.matmul %1, %2, %cst {dimension_numbers = #tpu.dot_dimension_numbers<[1], [0], [0], [1], [0, 0, 1, 1], [], []>} : vector<8x32xbf16>, vector<32x64xbf16>, vector<8x64xf32> -> vector<8x64xf32>
    %c0_3 = arith.constant 0 : index
    %c0_4 = arith.constant 0 : index
    %4 = vector.load %arg3[%c0_3, %c0_4] : memref<1x64xf32, #tpu.memory_space<vmem>>, vector<1x64xf32>
    %5 = vector.broadcast %4 : vector<1x64xf32> to vector<8x64xf32>
    %6 = arith.addf %3, %5 : vector<8x64xf32>
    %cst_5 = arith.constant 0.000000e+00 : f32
    %7 = vector.broadcast %cst_5 : f32 to vector<8x64xf32>
    %8 = arith.maximumf %6, %7 : vector<8x64xf32>
    %9 = arith.truncf %8 : vector<8x64xf32> to vector<8x64xbf16>
    %c0_6 = arith.constant 0 : index
    %c0_7 = arith.constant 0 : index
    %10 = vector.load %arg4[%c0_6, %c0_7] : memref<64x16xbf16, #tpu.memory_space<vmem>>, vector<64x16xbf16>
    %cst_8 = arith.constant dense<0.000000e+00> : vector<8x16xf32>
    %11 = tpu.matmul %9, %10, %cst_8 {dimension_numbers = #tpu.dot_dimension_numbers<[1], [0], [0], [1], [0, 0, 1, 1], [], []>} : vector<8x64xbf16>, vector<64x16xbf16>, vector<8x16xf32> -> vector<8x16xf32>
    %c0_9 = arith.constant 0 : index
    %c0_10 = arith.constant 0 : index
    %12 = vector.load %arg5[%c0_9, %c0_10] : memref<1x16xf32, #tpu.memory_space<vmem>>, vector<1x16xf32>
    %13 = vector.broadcast %12 : vector<1x16xf32> to vector<8x16xf32>
    %14 = arith.addf %11, %13 : vector<8x16xf32>
    %15 = arith.negf %14 : vector<8x16xf32>
    %16 = math.exp %15 : vector<8x16xf32>
    %cst_11 = arith.constant 1.000000e+00 : f32
    %17 = vector.broadcast %cst_11 : f32 to vector<8x16xf32>
    %18 = arith.addf %17, %16 : vector<8x16xf32>
    %19 = arith.divf %17, %18 : vector<8x16xf32>
    %c0_12 = arith.constant 0 : index
    %c0_13 = arith.constant 0 : index
    %20 = vector.load %arg6[%c0_12, %c0_13] : memref<8x16xf32, #tpu.memory_space<vmem>>, vector<8x16xf32>
    tpu.vector_store %arg6[%c0_12, %c0_13], %19 {strides = array<i32>} : memref<8x16xf32, #tpu.memory_space<vmem>>, vector<8x16xf32>,
    return
  }
  func.func @transform_0(%arg0: i32) -> (i32, i32) {
    %c0_i32 = arith.constant 0 : i32
    %c0_i32_0 = arith.constant 0 : i32
    return %arg0, %c0_i32 : i32, i32
  }
  func.func @transform_1(%arg0: i32) -> (i32, i32) {
    %c0_i32 = arith.constant 0 : i32
    %c0_i32_0 = arith.constant 0 : i32
    %c0_i32_1 = arith.constant 0 : i32
    return %c0_i32, %c0_i32_0 : i32, i32
  }
  func.func @transform_2(%arg0: i32) -> (i32, i32) {
    %c0_i32 = arith.constant 0 : i32
    %c0_i32_0 = arith.constant 0 : i32
    %c0_i32_1 = arith.constant 0 : i32
    return %c0_i32, %c0_i32_0 : i32, i32
  }
  func.func @transform_3(%arg0: i32) -> (i32, i32) {
    %c0_i32 = arith.constant 0 : i32
    %c0_i32_0 = arith.constant 0 : i32
    %c0_i32_1 = arith.constant 0 : i32
    return %c0_i32, %c0_i32_0 : i32, i32
  }
  func.func @transform_4(%arg0: i32) -> (i32, i32) {
    %c0_i32 = arith.constant 0 : i32
    %c0_i32_0 = arith.constant 0 : i32
    %c0_i32_1 = arith.constant 0 : i32
    return %c0_i32, %c0_i32_0 : i32, i32
  }
  func.func @transform_5(%arg0: i32) -> (i32, i32) {
    %c0_i32 = arith.constant 0 : i32
    %c0_i32_0 = arith.constant 0 : i32
    return %arg0, %c0_i32 : i32, i32
  }
}

</mosaic_0001>

<bundles_post_ra>
// kernel: multilabel_nn_forward.1
= control target key start
LH: loop header
LB: loop body
LE: loop exit
PB: predicated region body
PF: predicated region fallthrough
CT: control target
= control target key end

     0   :  { %v272_v1 = vmov 0.0   ;;  %vm273_vm0 = vmmov 0   ;;  %vm47_vm1 = vcmask 261120   ;;  %s335_s0 = inlined_call_operand.vmem [shape: f32[8,32], index: 0, kind: input, shape index: {}]   ;;  %s336_s1 = inlined_call_operand.vmem [shape: bf16[32,64], index: 1, kind: input, shape index: {}]   ;;  %s337_s2 = inlined_call_operand.vmem [shape: f32[1,64], index: 2, kind: input, shape index: {}]   ;;  %s338_s3 = inlined_call_operand.vmem [shape: bf16[64,16], index: 3, kind: input, shape index: {}]   ;;  %s339_s4 = inlined_call_operand.vmem [shape: f32[1,16], index: 4, kind: input, shape index: {}]   ;;  %s340_s5 = inlined_call_operand.hbm [shape: f32[8,16], index: 5, kind: output, shape index: {}]  }
   0x1   :  { %v240_v0 = vld [vmem:[%s336_s1 + $0x8] sm:$0xff]   ;;  %217 = vmatprep.subr.bf16.mxu0 %v272_v1  ;;  %v241_v2 = vld [vmem:[%s336_s1] sm:$0xff]   ;;  %225 = vmatprep.subr.bf16.mxu1 %v272_v1  ;;  %v242_v4 = vld [vmem:[%s338_s3 + $0x18] sm:$0xff]  }
   0x2   :  { %218 = vmatpush3.bf16.msra.mxu0 %v240_v0  ;;  %221 = vmatprep.mubr.msk.bf16.mxu0 %vm273_vm0, %v272_v1  ;;  %v22_v3 = vld [vmem:[%s335_s0] sm:$0xff]  ;;  %v243_v5 = vld [vmem:[%s338_s3 + $0x10] sm:$0xff]  }
   0x3   :  { %219 = vmatprep.subr.bf16.mxu0 %v272_v1  ;;  %233 = vmatprep.mubr.msk.bf16.mxu1 %vm273_vm0, %v272_v1  ;;  %v23_v6 = vpack.c.bf16 %v22_v3, %v22_v3 }
   0x4   :  { %226 = vmatpush3.bf16.msra.mxu1 %v242_v4 }
   0x5   :  { %227 = vmatprep.subr.bf16.mxu1 %v272_v1 }
   0x6   :  { %220 = vmatpush3.bf16.msra.mxu0 %v241_v2 }
   0x7   :  { %10 = vsyncpa [#allocation3], 0  ;;  %v244_v7 = vld [vmem:[%s338_s3 + $0x8] sm:$0xff]   ;;  %v245_v8 = vld [vmem:[%s338_s3] sm:$0xff]   ;;  %vm132_vm2 = vcmask 523264   ;;  %vm182_vm3 = vcmask 130048  }
   0x8   :  { %228 = vmatpush3.bf16.msra.mxu1 %v243_v5  ;;  %v198_v9 = vld [vmem:[%s337_s2] ss:$0 sm:$0xff]  ;;  %s274_s2 = smov [#allocation2]  }
   0x9   :  { %222 = vmatmul.mubr.msk.bf16.vlgmr.msra.gmra.mxu0 %vm47_vm1, %v23_v6  ;;  %229 = vmatprep.subr.bf16.mxu1 %v272_v1  ;;  %v202_v17 = vld [vmem:[%s339_s4] ss:$0 sm:$0xff]  ;;  %s190_s3 = sshll.u32 %s274_s2, 4  ;;  %s191_s3 = int_to_ptr.vmem [resolvable:$true] %s190_s3 }
   0xa   :  { %s250_s9 = scalar_lea.vmem %s191_s3, 128  ;;  %p255_p1 = scmp.lt.s32.totalorder %s191_s3, %s191_s3 }
   0xb   :  { %p251_p0 = scmp.ne.s32.totalorder %s191_s3, %s250_s9  ;;  %p256_p2 = scmp.lt.s32.totalorder %s250_s9, %s250_s9 }
   0xc   :  { %230 = vmatpush3.bf16.msra.mxu1 %v244_v7 }
   0xd   :  { %231 = vmatprep.subr.bf16.mxu1 %v272_v1  ;;  %p257_p3 = por %p256_p2, %p255_p1 }
   0xf   :  { %p258_p4 = pnand %p257_p3, %p251_p0 }
  0x10   :  { %232 = vmatpush3.bf16.msra.mxu1 %v245_v8 }
  0xc9   :  { %v85_v10 = vpop.f32.mrf.mxu0 }
  0xca   :  { %v86_v11 = vadd.f32 %v198_v9, %v85_v10 }
  0xcb   :  { %v223_v12 = vpop.f32.mrf.mxu0 }
  0xcc   :  { %v91_v13 = vmax.f32 %v86_v11, 0.0 }
  0xcd   :  { %v88_v14 = vpop.f32.mrf.mxu0 }
  0xce   :  { %v92_v15 = vpack.c.bf16 %v91_v13, %v91_v13 }
  0xcf   :  { %v224_v16 = vpop.f32.mrf.mxu0 }
  0xd0   :  { %234 = vmatmul.mubr.msk.bf16.vlgmr.msra.gmra.mxu1 %vm132_vm2, %v92_v15 }
 0x190   :  { %v170_v18 = vpop.f32.mrf.mxu1 }
 0x191   :  { %v171_v19 = vadd.f32 %v202_v17, %v170_v18 }
 0x192   :  { %v235_v20 = vpop.f32.mrf.mxu1 }
 0x193   :  { %v208_v21 = vmul.f32 -1.442695, %v171_v19 }
 0x194   :  { %v173_v22 = vpop.f32.mrf.mxu1 }
 0x195   :  { %246 = vpow2.f32 %v208_v21 }
 0x196   :  { %v236_v23 = vpop.f32.mrf.mxu1 }
 0x1a2   :  { %v247_v24 = vpop.eup %246 }
 0x1a3   :  { %v179_v25 = vadd.f32 1.0, %v247_v24 }
 0x1a5   :  { %248 = vrcp.f32 %v179_v25 }
 0x1b2   :  { %v249_v26 = vpop.eup %248 }
 0x1b3   :  { %183 = vst.msk [vmem:[#allocation2] sm:$0xff] %vm182_vm3, %v249_v26 }
 0x1b4   :  { %261 = shalt.err (!%p258_p4)
}
 0x1b5   :  { %193 = dma.vmem_to_hbm [thread:$0]  %s191_s3, 128, %s340_s5, [#allocation3]  }
 0x1b6   :  { %270 = dma.done.wait [#allocation3], 128  }
 0x1b7   :  { %271 = vsyncadd [#allocation3], 4294967168 }
 0x1b8   :  { %197 = vsyncpa [#allocation3], 1 }

</bundles_post_ra>
